<compile_context>
chip_gen: v6e
topology: v6e:2x2x1
jax: 0.10.0
libtpu: 0.0.40
codegen_flags: <defaults>
</compile_context>

<pallas_src>
import functools

import jax
import jax.numpy as jnp
from jax.experimental import pallas as pl
from jax.experimental.pallas import tpu as pltpu


_OUT_PAD = 128   # lane-dense classifier output width (true logits = first 2 lanes)
_OUT_SUB = 8     # sublane-dense output tile height


# ----------------------------- fused Pallas kernel ---------------------------

def _make_fused_kernel(num_convs):
    """Build the fused forward kernel for a fixed (static) number of conv layers."""

    def kernel(a_ref, h0_ref, *rest):
        # rest = (w0, b0, w1, b1, ..., wc_pad, bc_pad, o_ref)
        o_ref = rest[-1]
        wc_ref, bc_ref = rest[-3], rest[-2]
        conv_refs = rest[:-3]

        a = a_ref[...]                                   # [N, N]  normalized adjacency

        # --- layer 0: h0 is [N, 1] -> keep the K=1 contraction off the MXU ---
        h0_row = h0_ref[...]                             # [1, N]  (in-degrees as a row)
        agg = jnp.sum(a * h0_row, axis=1, keepdims=True) # [N, 1]  VPU mul + lane reduce
        w0 = conv_refs[0][...]                           # [1, F1]
        b0 = conv_refs[1][...]                           # [1, F1]
        h = jnp.maximum(agg * w0 + b0, 0.0)              # outer-product broadcast -> [N, F1]

        # --- remaining layers: MXU matmuls, h stays resident (never hits HBM) ---
        for i in range(1, num_convs):
            w = conv_refs[2 * i][...]
            b = conv_refs[2 * i + 1][...]
            agg = jnp.dot(a, h, preferred_element_type=jnp.float32)          # [N, F]
            h = jnp.maximum(
                jnp.dot(agg, w, preferred_element_type=jnp.float32) + b, 0.0)

        # --- mean_nodes + classifier (no node padding, so plain mean is exact) ---
        hg = jnp.mean(h, axis=0, keepdims=True)                              # [1, F_last]
        logits = jnp.dot(hg, wc_ref[...],
                         preferred_element_type=jnp.float32) + bc_ref[...]   # [1, 128]

        # lane/sublane-dense unmasked store (broadcast into the (8, 128) tile)
        o_ref[...] = jnp.broadcast_to(logits, o_ref.shape)

    return kernel


# --------------------------------- wrappers ----------------------------------

def stargazer_gnn_forward_batched(adjs, params):
    """adjs: [G, N, N] dense adjacencies (A[g, u, v] = 1 for edge u->v). -> [G, 2] logits."""
    adjs = adjs.astype(jnp.float32)
    G, N, _ = adjs.shape

    # --- setup (not the hot path): degree features + DGL 'both' normalization ---
    in_deg = jnp.sum(adjs, axis=1)                        # [G, N]  in-degree(v)  (column sum)
    out_deg = jnp.sum(adjs, axis=2)                       # [G, N]  out-degree(u) (row sum)
    norm_src = jnp.where(out_deg > 0, jax.lax.rsqrt(out_deg), 0.0)
    norm_dst = jnp.where(in_deg > 0, jax.lax.rsqrt(in_deg), 0.0)
    # A_hat[v, u] = A[u, v] / sqrt(d_out(u) * d_in(v))
    a_hat = (norm_dst[:, :, None] * jnp.swapaxes(adjs, 1, 2) * norm_src[:, None, :])
    a_hat = a_hat.astype(jnp.float32)
    h0_row = in_deg[:, None, :].astype(jnp.float32)       # [G, 1, N]  (h0 as a lane row)

    num_convs = len(params["convs"])
    kernel = _make_fused_kernel(num_convs)

    # classifier weights zero-padded to 128 lanes -> lane-dense output store
    wc, bc = params["classify"]
    wc_pad = jnp.pad(wc, ((0, 0), (0, _OUT_PAD - wc.shape[1]))).astype(jnp.float32)
    bc_pad = jnp.pad(bc, ((0, 0), (0, _OUT_PAD - bc.shape[1]))).astype(jnp.float32)

    in_specs = [
        pl.BlockSpec((None, N, N), lambda g: (g, 0, 0)),   # per-graph A_hat
        pl.BlockSpec((None, 1, N), lambda g: (g, 0, 0)),   # per-graph h0 row
    ]
    args = [a_hat, h0_row]
    for (w, b) in params["convs"]:
        in_specs.append(pl.BlockSpec(w.shape, lambda g: (0, 0)))   # shared weights:
        in_specs.append(pl.BlockSpec(b.shape, lambda g: (0, 0)))   # constant block index -> single DMA
        args.extend([w.astype(jnp.float32), b.astype(jnp.float32)])
    in_specs.append(pl.BlockSpec(wc_pad.shape, lambda g: (0, 0)))
    in_specs.append(pl.BlockSpec(bc_pad.shape, lambda g: (0, 0)))
    args.extend([wc_pad, bc_pad])

    out = pl.pallas_call(
        kernel,
        out_shape=jax.ShapeDtypeStruct((G, _OUT_SUB, _OUT_PAD), jnp.float32),
        grid=(G,),
        in_specs=in_specs,
        out_specs=pl.BlockSpec((None, _OUT_SUB, _OUT_PAD), lambda g: (g, 0, 0)),
        compiler_params=pltpu.CompilerParams(
            dimension_semantics=("parallel",)),            # graphs shard across TensorCores
    )(*args)

    return out[:, 0, :2]                                   # [G, 2] true logits


def stargazer_gnn_forward(adj, params):
    """Single-graph forward, matching the PyTorch module: returns [1, 2] logits."""
    return stargazer_gnn_forward_batched(adj[None], params)


# ------------------------------ pure-JAX reference ---------------------------

def _reference_forward(adj, params):
    adj = adj.astype(jnp.float32)
    in_deg = jnp.sum(adj, axis=0)
    out_deg = jnp.sum(adj, axis=1)
    h = in_deg.reshape(-1, 1)
    norm_src = jnp.where(out_deg > 0, jax.lax.rsqrt(out_deg), 0.0)
    norm_dst = jnp.where(in_deg > 0, jax.lax.rsqrt(in_deg), 0.0)
    a_hat = norm_dst[:, None] * adj.T * norm_src[None, :]
    for (w, b) in params["convs"]:
        h = jnp.maximum(a_hat @ h @ w + b, 0.0)
    hg = jnp.mean(h, axis=0, keepdims=True)
    wc, bc = params["classify"]
    return hg @ wc + bc


# ------------------------------- parameter init -------------------------------

def init_params(key, num_hidden_features):
    """GraphConv: Xavier-uniform weight [fin, fout], zero bias.
    Linear(F, 2): PyTorch-default uniform(+/- 1/sqrt(fin))."""
    params = {"convs": [], "classify": None}
    for i in range(len(num_hidden_features) - 1):
        fin, fout = num_hidden_features[i], num_hidden_features[i + 1]
        key, k1 = jax.random.split(key)
        scale = (6.0 / (fin + fout)) ** 0.5
        w = jax.random.uniform(k1, (fin, fout), jnp.float32, -scale, scale)
        b = jnp.zeros((1, fout), jnp.float32)
        params["convs"].append((w, b))
    fin = num_hidden_features[-1]
    key, k1, k2 = jax.random.split(key, 3)
    bound = 1.0 / (fin ** 0.5)
    wc = jax.random.uniform(k1, (fin, 2), jnp.float32, -bound, bound)
    bc = jax.random.uniform(k2, (1, 2), jnp.float32, -bound, bound)
    params["classify"] = (wc, bc)
    return params


# ------------------------------------ main ------------------------------------

if __name__ == "__main__":
    key = jax.random.PRNGKey(0)
    k_adj, k_params = jax.random.split(key)

    N = 16                                  # nodes per graph
    G = 2                                   # small batch of graphs (parallel grid axis)
    num_hidden_features = [1, 32, 32]       # input feature dim is 1 (in-degree)

    # deterministic random directed graphs (no self loops)
    adjs = (jax.random.uniform(k_adj, (G, N, N)) < 0.3).astype(jnp.float32)
    adjs = adjs * (1.0 - jnp.eye(N, dtype=jnp.float32))[None]

    params = init_params(k_params, num_hidden_features)

    # batched fused forward
    out_batched = jax.block_until_ready(stargazer_gnn_forward_batched(adjs, params))
    assert out_batched.shape == (G, 2) and out_batched.dtype == jnp.float32

    # single-graph forward matching the original module signature
    out_single = jax.block_until_ready(stargazer_gnn_forward(adjs[0], params))
    assert out_single.shape == (1, 2) and out_single.dtype == jnp.float32

    # correctness vs. pure-JAX reference
    ref0 = _reference_forward(adjs[0], params)
    ref1 = _reference_forward(adjs[1], params)
    assert jnp.allclose(out_single, ref0, atol=1e-5, rtol=1e-5)
    assert jnp.allclose(out_batched[0:1], ref0, atol=1e-5, rtol=1e-5)
    assert jnp.allclose(out_batched[1:2], ref1, atol=1e-5, rtol=1e-5)

    print("KERNEL_OK")
</pallas_src>

<mosaic_0001>
module attributes {stable_mosaic.version = 11 : i64} {
  func.func @kernel(%arg0: i32, %arg1: memref<1x16x16xf32, #tpu.memory_space<vmem>>, %arg2: memref<1x1x16xf32, #tpu.memory_space<vmem>>, %arg3: memref<1x32xf32, #tpu.memory_space<vmem>>, %arg4: memref<1x32xf32, #tpu.memory_space<vmem>>, %arg5: memref<32x32xf32, #tpu.memory_space<vmem>>, %arg6: memref<1x32xf32, #tpu.memory_space<vmem>>, %arg7: memref<32x128xf32, #tpu.memory_space<vmem>>, %arg8: memref<1x128xf32, #tpu.memory_space<vmem>>, %arg9: memref<1x8x128xf32, #tpu.memory_space<vmem>>) attributes {dimension_semantics = [#tpu.dimension_semantics<parallel>], iteration_bounds = array<i64: 2>, scalar_prefetch = 0 : i64, scratch_operands = 0 : i64, tpu.core_type = #tpu.core_type<tc>, window_params = [{transform_indices = @transform_0, window_bounds = array<i64: 1, 16, 16>}, {transform_indices = @transform_1, window_bounds = array<i64: 1, 1, 16>}, {pipeline_mode = #tpu.pipeline_mode<synchronous>, transform_indices = @transform_2, window_bounds = array<i64: 1, 32>}, {pipeline_mode = #tpu.pipeline_mode<synchronous>, transform_indices = @transform_3, window_bounds = array<i64: 1, 32>}, {pipeline_mode = #tpu.pipeline_mode<synchronous>, transform_indices = @transform_4, window_bounds = array<i64: 32, 32>}, {pipeline_mode = #tpu.pipeline_mode<synchronous>, transform_indices = @transform_5, window_bounds = array<i64: 1, 32>}, {pipeline_mode = #tpu.pipeline_mode<synchronous>, transform_indices = @transform_6, window_bounds = array<i64: 32, 128>}, {pipeline_mode = #tpu.pipeline_mode<synchronous>, transform_indices = @transform_7, window_bounds = array<i64: 1, 128>}, {transform_indices = @transform_8, window_bounds = array<i64: 1, 8, 128>}]} {
    %c0 = arith.constant 0 : index
    %c0_0 = arith.constant 0 : index
    %c0_1 = arith.constant 0 : index
    %0 = vector.load %arg1[%c0, %c0_0, %c0_1] : memref<1x16x16xf32, #tpu.memory_space<vmem>>, vector<1x16x16xf32>
    %1 = vector.shape_cast %0 : vector<1x16x16xf32> to vector<16x16xf32>
    %c0_2 = arith.constant 0 : index
    %c0_3 = arith.constant 0 : index
    %c0_4 = arith.constant 0 : index
    %2 = vector.load %arg2[%c0_2, %c0_3, %c0_4] : memref<1x1x16xf32, #tpu.memory_space<vmem>>, vector<1x1x16xf32>
    %3 = vector.shape_cast %2 : vector<1x1x16xf32> to vector<1x16xf32>
    %4 = vector.broadcast %3 : vector<1x16xf32> to vector<16x16xf32>
    %5 = arith.mulf %1, %4 : vector<16x16xf32>
    %cst = arith.constant dense<0.000000e+00> : vector<16xf32>
    %6 = vector.multi_reduction <add>, %5, %cst [1] : vector<16x16xf32> to vector<16xf32>
    %7 = vector.shape_cast %6 : vector<16xf32> to vector<16x1xf32>
    %c0_5 = arith.constant 0 : index
    %c0_6 = arith.constant 0 : index
    %8 = vector.load %arg3[%c0_5, %c0_6] : memref<1x32xf32, #tpu.memory_space<vmem>>, vector<1x32xf32>
    %c0_7 = arith.constant 0 : index
    %c0_8 = arith.constant 0 : index
    %9 = vector.load %arg4[%c0_7, %c0_8] : memref<1x32xf32, #tpu.memory_space<vmem>>, vector<1x32xf32>
    %10 = vector.broadcast %7 : vector<16x1xf32> to vector<16x32xf32>
    %11 = vector.broadcast %8 : vector<1x32xf32> to vector<16x32xf32>
    %12 = arith.mulf %10, %11 : vector<16x32xf32>
    %13 = vector.broadcast %9 : vector<1x32xf32> to vector<16x32xf32>
    %14 = arith.addf %12, %13 : vector<16x32xf32>
    %cst_9 = arith.constant 0.000000e+00 : f32
    %15 = vector.broadcast %cst_9 : f32 to vector<16x32xf32>
    %16 = arith.maximumf %14, %15 : vector<16x32xf32>
    %c0_10 = arith.constant 0 : index
    %c0_11 = arith.constant 0 : index
    %17 = vector.load %arg5[%c0_10, %c0_11] : memref<32x32xf32, #tpu.memory_space<vmem>>, vector<32x32xf32>
    %c0_12 = arith.constant 0 : index
    %c0_13 = arith.constant 0 : index
    %18 = vector.load %arg6[%c0_12, %c0_13] : memref<1x32xf32, #tpu.memory_space<vmem>>, vector<1x32xf32>
    %cst_14 = arith.constant dense<0.000000e+00> : vector<16x32xf32>
    %19 = tpu.matmul %1, %16, %cst_14 {dimension_numbers = #tpu.dot_dimension_numbers<[1], [0], [0], [1], [0, 0, 1, 1], [], []>} : vector<16x16xf32>, vector<16x32xf32>, vector<16x32xf32> -> vector<16x32xf32>
    %cst_15 = arith.constant dense<0.000000e+00> : vector<16x32xf32>
    %20 = tpu.matmul %19, %17, %cst_15 {dimension_numbers = #tpu.dot_dimension_numbers<[1], [0], [0], [1], [0, 0, 1, 1], [], []>} : vector<16x32xf32>, vector<32x32xf32>, vector<16x32xf32> -> vector<16x32xf32>
    %21 = vector.broadcast %18 : vector<1x32xf32> to vector<16x32xf32>
    %22 = arith.addf %20, %21 : vector<16x32xf32>
    %cst_16 = arith.constant 0.000000e+00 : f32
    %23 = vector.broadcast %cst_16 : f32 to vector<16x32xf32>
    %24 = arith.maximumf %22, %23 : vector<16x32xf32>
    %cst_17 = arith.constant dense<0.000000e+00> : vector<32xf32>
    %25 = vector.multi_reduction <add>, %24, %cst_17 [0] : vector<16x32xf32> to vector<32xf32>
    %26 = vector.shape_cast %25 : vector<32xf32> to vector<1x32xf32>
    %cst_18 = arith.constant 1.600000e+01 : f32
    %27 = vector.broadcast %cst_18 : f32 to vector<1x32xf32>
    %28 = arith.divf %26, %27 : vector<1x32xf32>
    %c0_19 = arith.constant 0 : index
    %c0_20 = arith.constant 0 : index
    %29 = vector.load %arg7[%c0_19, %c0_20] : memref<32x128xf32, #tpu.memory_space<vmem>>, vector<32x128xf32>
    %cst_21 = arith.constant dense<0.000000e+00> : vector<1x128xf32>
    %30 = tpu.matmul %28, %29, %cst_21 {dimension_numbers = #tpu.dot_dimension_numbers<[1], [0], [0], [1], [0, 0, 1, 1], [], []>} : vector<1x32xf32>, vector<32x128xf32>, vector<1x128xf32> -> vector<1x128xf32>
    %c0_22 = arith.constant 0 : index
    %c0_23 = arith.constant 0 : index
    %31 = vector.load %arg8[%c0_22, %c0_23] : memref<1x128xf32, #tpu.memory_space<vmem>>, vector<1x128xf32>
    %32 = arith.addf %30, %31 : vector<1x128xf32>
    %33 = vector.shape_cast %32 : vector<1x128xf32> to vector<1x128xf32>
    %34 = vector.broadcast %33 : vector<1x128xf32> to vector<8x128xf32>
    %c0_24 = arith.constant 0 : index
    %c0_25 = arith.constant 0 : index
    %c0_26 = arith.constant 0 : index
    %35 = vector.load %arg9[%c0_24, %c0_25, %c0_26] : memref<1x8x128xf32, #tpu.memory_space<vmem>>, vector<1x8x128xf32>
    %36 = vector.shape_cast %35 : vector<1x8x128xf32> to vector<8x128xf32>
    %37 = vector.shape_cast %34 : vector<8x128xf32> to vector<1x8x128xf32>
    tpu.vector_store %arg9[%c0_24, %c0_25, %c0_26], %37 {strides = array<i32>} : memref<1x8x128xf32, #tpu.memory_space<vmem>>, vector<1x8x128xf32>,
    return
  }
  func.func @transform_0(%arg0: i32) -> (i32, i32, i32) {
    %c0_i32 = arith.constant 0 : i32
    %c0_i32_0 = arith.constant 0 : i32
    %c0_i32_1 = arith.constant 0 : i32
    return %arg0, %c0_i32, %c0_i32_0 : i32, i32, i32
  }
  func.func @transform_1(%arg0: i32) -> (i32, i32, i32) {
    %c0_i32 = arith.constant 0 : i32
    %c0_i32_0 = arith.constant 0 : i32
    %c0_i32_1 = arith.constant 0 : i32
    return %arg0, %c0_i32, %c0_i32_0 : i32, i32, i32
  }
  func.func @transform_2(%arg0: i32) -> (i32, i32) {
    %c0_i32 = arith.constant 0 : i32
    %c0_i32_0 = arith.constant 0 : i32
    %c0_i32_1 = arith.constant 0 : i32
    return %c0_i32, %c0_i32_0 : i32, i32
  }
  func.func @transform_3(%arg0: i32) -> (i32, i32) {
    %c0_i32 = arith.constant 0 : i32
    %c0_i32_0 = arith.constant 0 : i32
    %c0_i32_1 = arith.constant 0 : i32
    return %c0_i32, %c0_i32_0 : i32, i32
  }
  func.func @transform_4(%arg0: i32) -> (i32, i32) {
    %c0_i32 = arith.constant 0 : i32
    %c0_i32_0 = arith.constant 0 : i32
    %c0_i32_1 = arith.constant 0 : i32
    return %c0_i32, %c0_i32_0 : i32, i32
  }
  func.func @transform_5(%arg0: i32) -> (i32, i32) {
    %c0_i32 = arith.constant 0 : i32
    %c0_i32_0 = arith.constant 0 : i32
    %c0_i32_1 = arith.constant 0 : i32
    return %c0_i32, %c0_i32_0 : i32, i32
  }
  func.func @transform_6(%arg0: i32) -> (i32, i32) {
    %c0_i32 = arith.constant 0 : i32
    %c0_i32_0 = arith.constant 0 : i32
    %c0_i32_1 = arith.constant 0 : i32
    return %c0_i32, %c0_i32_0 : i32, i32
  }
  func.func @transform_7(%arg0: i32) -> (i32, i32) {
    %c0_i32 = arith.constant 0 : i32
    %c0_i32_0 = arith.constant 0 : i32
    %c0_i32_1 = arith.constant 0 : i32
    return %c0_i32, %c0_i32_0 : i32, i32
  }
  func.func @transform_8(%arg0: i32) -> (i32, i32, i32) {
    %c0_i32 = arith.constant 0 : i32
    %c0_i32_0 = arith.constant 0 : i32
    %c0_i32_1 = arith.constant 0 : i32
    return %arg0, %c0_i32, %c0_i32_0 : i32, i32, i32
  }
}

</mosaic_0001>

<bundles_post_ra>
// kernel: tpu_custom_call.1
= control target key start
LH: loop header
LB: loop body
LE: loop exit
PB: predicated region body
PF: predicated region fallthrough
CT: control target
= control target key end

     0   :  { %s1452_s0 = inlined_call_operand.hbm [shape: f32[2,16,16], index: 0, kind: input, shape index: {}]   ;;  %s1453_s1 = inlined_call_operand.hbm [shape: f32[2,1,16], index: 1, kind: input, shape index: {}]   ;;  %s1454_s2 = inlined_call_operand.vmem [shape: f32[1,32], index: 2, kind: input, shape index: {}]   ;;  %s1455_s3 = inlined_call_operand.vmem [shape: f32[1,32], index: 3, kind: input, shape index: {}]   ;;  %s1456_s4 = inlined_call_operand.hbm [shape: f32[32,32], index: 4, kind: input, shape index: {}]   ;;  %s1457_s5 = inlined_call_operand.vmem [shape: f32[1,32], index: 5, kind: input, shape index: {}]   ;;  %s1458_s6 = inlined_call_operand.hbm [shape: f32[32,128], index: 6, kind: input, shape index: {}]   ;;  %s1459_s7 = inlined_call_operand.vmem [shape: f32[1,128], index: 7, kind: input, shape index: {}]   ;;  %s1460_s8 = inlined_call_operand.hbm [shape: f32[2,8,128], index: 8, kind: output, shape index: {}]  }
   0x1   :  { %1471 = sst [smem:[#allocation20_spill]] %s1452_s0 }
   0x2   :  { %1472 = sst [smem:[#allocation21_spill]] %s1456_s4 }
   0x3   :  { %1473 = sst [smem:[#allocation22_spill]] %s1458_s6 }
   0x4   :  { %13 = vsyncpa [#allocation3], 0 }
   0x5   :  { %15 = vsyncpa [#allocation3 + $0x1], 0 }
   0x6   :  { %16 = vsyncpa [#allocation6], 0 }
   0x7   :  { %18 = vsyncpa [#allocation6 + $0x1], 0 }
   0x8   :  { %19 = vsyncpa [#allocation9], 0 }
   0x9   :  { %20 = vsyncpa [#allocation4], 0 }
   0xa   :  { %22 = vsyncpa [#allocation4 + $0x1], 0  ;;  %s1206_s27 = smov 0   ;;  %s1208_s28 = smov 0  }
   0xb   :  { %s1210_s29 = smov 0   ;;  %s1212_s30 = smov 0  }
   0xc LB: > { %1474 = sst [smem:[#allocation16_spill]] %s1146_s29  ;;  %s1227_s9 = sadd.s32 4294967295, %s1150_s30   ;;  %s1150_s30 = sphi %s1212_s30, %s1501_s30   ;;  %s1146_s29 = sphi %s1210_s29, %s1503_s29   ;;  %s1142_s28 = sphi %s1208_s28, %s1505_s28   ;;  %s1138_s27 = sphi %s1206_s27, %s1504_s27  }
   0xd   : > { %s818_s10 = sadd.s32 4294967294, %s1150_s30   ;;  %p48_p0 = scmp.ne.s32.totalorder %s1142_s28, %s1138_s27 }
   0xe   : > { %p1463_p1 = scmp.eq.s32.totalorder %s1227_s9, 0  ;;  %p224_p2 = scmp.eq.s32.totalorder %s1227_s9, 1 }
   0xf   : > { %p230_p3 = scmp.eq.s32.totalorder %s818_s10, 1  ;;  %p819_p5 = scmp.ge.s32.totalorder %s1150_s30, 1 }
  0x10   : > { %p1236_p4 = por %p1463_p1, %p48_p0  ;;  %p237_p7 = scmp.lt.s32.totalorder %s1150_s30, 3 }
  0x11   : > { %p1241_p6 = por %p230_p3, %p48_p0  ;;  %s1152_s14 = smov [#allocation7]  }
  0x12   : > { %s1475_s11 = scalar_select %p1236_p4, 1, 0 }
  0x13   : > { %s1476_s12 = scalar_select %p1241_p6, 1, 0 }
  0x14   : > { %p1246_p8 = pnand %p819_p5, %p237_p7  ;;  %s255_s15 = sshll.u32 %s1152_s14, 4  ;;  %s256_s15 = int_to_ptr.vmem [resolvable:$true] %s255_s15 }
  0x15   : > { %1477 = sst [smem:[#allocation17_spill]] %s1476_s12  ;;  %s1153_s17 = smov [#allocation8]  }
  0x16   : > { %s1478_s13 = scalar_select %p1246_p8, 1, 0 }
  0x17   : > { %p904_p9 = pneg %p1246_p8  ;;  %s271_s18 = sshll.u32 %s1153_s17, 4  ;;  %s272_s18 = int_to_ptr.vmem [resolvable:$true] %s271_s18 }
  0x18   : > { %s977_s19 = scalar_lea.vmem %s256_s15, 512  ;;  %p985_p5 = scmp.lt.s32.totalorder %s256_s15, %s256_s15 }
  0x19   : > { %p1255_p11 = pnand %p904_p9, %p1463_p1  ;;  %p978_p13 = scmp.ne.s32.totalorder %s256_s15, %s977_s19 }
  0x1a   : > { %p986_p7 = scmp.lt.s32.totalorder %s977_s19, %s977_s19 }
  0x1b   : > { %p968_p12 = pneg %p1255_p11 }
  0x1c   : > { %p987_p10 = por %p986_p7, %p985_p5 }
  0x1d   : > { %p980_p0 = pnand %p978_p13, %p968_p12 }
  0x1f   : > { %p981_p3 = pneg %p980_p0 }
  0x21   : > { %p988_p9 = pnand %p987_p10, %p981_p3 }
  0x23   : > { %991 = shalt.err (!%p988_p9)
}
  0x24   : > { %s1461_s20 = smov 128   ;;  %s1462_s21 = smov 8  }
  0x25   : > { %s1480_s4 = sld [smem:[#allocation21_spill]]  ;;  %s1003_s24 = scalar_lea.vmem %s272_s18, 512 }
  0x26   : > { %p1004_p13 = scmp.ne.s32.totalorder %s272_s18, %s1003_s24  ;;  %p1011_p10 = scmp.lt.s32.totalorder %s272_s18, %s272_s18 }
  0x27   : > { %p1012_p3 = scmp.lt.s32.totalorder %s1003_s24, %s1003_s24 }
  0x28   : > { %p1006_p0 = pnand %p1004_p13, %p968_p12 }
  0x29   : > { %p1013_p7 = por %p1012_p3, %p1011_p10 }
  0x2a   : > { %p1007_p5 = pneg %p1006_p0 }
  0x2b   : > { %907 = dma.hbm_to_vmem [thread:$0]  (!%p1255_p11), %s1480_s4, 512, %s256_s15, [#allocation6], %s1461_s20, %s1461_s20, %s1462_s21  }
  0x2c   : > { %p1014_p9 = pnand %p1013_p7, %p1007_p5 }
  0x2e   : > { %1017 = shalt.err (!%p1014_p9)
}
  0x2f   : > { %s1481_s6 = sld [smem:[#allocation22_spill]]  ;;  %s1284_s10 = sadd.s32 1, %s1150_s30  }
  0x30   : > { %1482 = sst [smem:[#allocation18_spill]] %s1284_s10  ;;  %s35_s14 = sadd.s32 1, %s1146_s29 }
  0x31   : > { %s32_s15 = ssub.s32 %s1150_s30, %s1284_s10  ;;  %p42_p12 = scmp.ne.s32.totalorder %s1146_s29, %s1142_s28 }
  0x32   : > { %p33_p13 = scmp.eq.s32.totalorder %s32_s15, 0  ;;  %p43_p0 = scmp.eq.s32.totalorder %s1150_s30, 0 }
  0x33   : > { %p1294_p5 = por %p224_p2, %p42_p12  ;;  %p924_p10 = scmp.lt.s32.totalorder %s1150_s30, 2 }
  0x34   : > { %s1300_s17 = scalar_select %p33_p13, %s1146_s29, %s35_s14  }
  0x35   : > { %910 = dma.hbm_to_vmem [thread:$0]  (!%p1255_p11), %s1481_s6, 512, %s272_s18, [#allocation9], %s1461_s20, %s1461_s20, %s1462_s21  }
  0x36   : > { %s1483_s16 = scalar_select %p1294_p5, 1, 0 }
  0x37   : > { %1484 = sst [smem:[#allocation19_spill]] %s1300_s17  ;;  %p44_p3 = por %p43_p0, %p42_p12 }
  0x38   : > { %s1303_s19 = sand.u32 1, %s1146_s29   ;;  %s845_s22 = sshll.u32 %s1150_s30, 8 }
  0x39   : > { %s823_s18 = sshll.u32 %s1303_s19, 4  ;;  %s1485_s0 = sld [smem:[#allocation20_spill]] }
  0x3a   : > { %s292_s26 = scalar_lea.vmem [#allocation2], %s823_s18  ;;  %p1314_p2 = pnand %p924_p10, %p44_p3 }
  0x3b   : > { %s299_s15 = sshll.u32 %s292_s26, 4  ;;  %s1312_s15 = int_to_ptr.vmem [resolvable:$true] %s299_s15 }
  0x3c   : > { %p1020_p7 = pneg %p1314_p2 }
  0x3f   : > { %s1310_s25 = scalar_lea.hbm %s1485_s0, %s845_s22  ;;  %s1023_s23 = scalar_lea.hbm %s1485_s0, 512 }
  0x40   : > { %s1018_s4 = scalar_lea.hbm %s1310_s25, 256  ;;  %p1024_p13 = scmp.lt.s32.totalorder %s1310_s25, %s1485_s0 }
  0x41   : > { %p1019_p11 = scmp.ne.s32.totalorder %s1310_s25, %s1018_s4  ;;  %p1025_p0 = scmp.lt.s32.totalorder %s1023_s23, %s1018_s4 }
  0x43   : > { %p1021_p9 = pnand %p1020_p7, %p1019_p11  ;;  %p1026_p10 = por %p1025_p0, %p1024_p13 }
  0x45   : > { %p1022_p12 = pneg %p1021_p9 }
  0x47   : > { %p1027_p3 = pnand %p1026_p10, %p1022_p12 }
  0x49   : > { %1030 = shalt.err (!%p1027_p3)
}
  0x4a   : > { %s1031_s20 = scalar_lea.vmem %s1312_s15, 256  ;;  %s1156_s18 = smov [#allocation2]  }
  0x4b   : > { %p1032_p1 = scmp.ne.s32.totalorder %s1312_s15, %s1031_s20  ;;  %s1036_s22 = sshll.u32 %s1156_s18, 4  ;;  %s1037_s22 = int_to_ptr.vmem [resolvable:$false] %s1036_s22 }
  0x4c   : > { %s1038_s21 = scalar_lea.vmem %s1037_s22, 512  ;;  %p1039_p6 = scmp.lt.s32.totalorder %s1312_s15, %s1037_s22 }
  0x4d   : > { %p1034_p11 = pnand %p1032_p1, %p1020_p7  ;;  %p1040_p5 = scmp.lt.s32.totalorder %s1038_s21, %s1031_s20 }
  0x4f   : > { %p1035_p9 = pneg %p1034_p11  ;;  %p1041_p4 = por %p1040_p5, %p1039_p6 }
  0x51   : > { %p1042_p13 = pnand %p1041_p4, %p1035_p9 }
  0x53   : > { %1045 = shalt.err (!%p1042_p13)
}
  0x54   : > { %s1487_s4 = smov 8   ;;  %s1488_s23 = smov 128  }
  0x55   : > { %s1489_s24 = scalar_lea.sflag [#allocation3], %s1303_s19  ;;  %s826_s26 = sshll.u32 %s1150_s30, 4 }
  0x56   : > { %914 = dma.hbm_to_vmem [thread:$0]  (!%p1314_p2), %s1310_s25, 256, %s1312_s15, %s1489_s24, %s1488_s23, %s1488_s23, %s1487_s4  }
  0x57   : > { %s312_s18 = scalar_lea.vmem [#allocation5], %s1303_s19  ;;  %s317_s0 = scalar_lea.hbm %s1453_s1, %s826_s26 }
  0x58   : > { %s319_s20 = sshll.u32 %s312_s18, 4  ;;  %s1490_s6 = sand.u32 1, %s1150_s30   ;;  %s320_s20 = int_to_ptr.vmem [resolvable:$true] %s319_s20 }
  0x59   : > { %s310_s17 = scalar_lea.sflag [#allocation6], %s1490_s6  ;;  %s1046_s29 = scalar_lea.hbm %s317_s0, 16 }
  0x5a   : > { %p1047_p1 = scmp.ne.s32.totalorder %s317_s0, %s1046_s29  ;;  %s1051_s25 = scalar_lea.hbm %s1453_s1, 32 }
  0x5b   : > { %p1052_p5 = scmp.lt.s32.totalorder %s317_s0, %s1453_s1  ;;  %p1053_p12 = scmp.lt.s32.totalorder %s1051_s25, %s1046_s29 }
  0x5c   : > { %p1049_p4 = pnand %p1047_p1, %p1020_p7 }
  0x5d   : > { %p1054_p0 = por %p1053_p12, %p1052_p5 }
  0x5e   : > { %p1050_p6 = pneg %p1049_p4 }
  0x60   : > { %p1055_p10 = pnand %p1054_p0, %p1050_p6 }
  0x62   : > { %1058 = shalt.err (!%p1055_p10)
}
  0x63   : > { %s1059_s4 = scalar_lea.vmem %s320_s20, 16  ;;  %s1157_s6 = smov [#allocation5]  }
  0x64   : > { %p1060_p3 = scmp.ne.s32.totalorder %s320_s20, %s1059_s4  ;;  %s1064_s23 = sshll.u32 %s1157_s6, 4  ;;  %s1065_s23 = int_to_ptr.vmem [resolvable:$false] %s1064_s23 }
  0x65   : > { %s1066_s12 = scalar_lea.vmem %s1065_s23, 32  ;;  %p1067_p13 = scmp.lt.s32.totalorder %s320_s20, %s1065_s23 }
  0x66   : > { %p1062_p11 = pnand %p1060_p3, %p1020_p7  ;;  %p1068_p1 = scmp.lt.s32.totalorder %s1066_s12, %s1059_s4 }
  0x68   : > { %p1063_p9 = pneg %p1062_p11  ;;  %p1069_p4 = por %p1068_p1, %p1067_p13 }
  0x6a   : > { %p1070_p8 = pnand %p1069_p4, %p1063_p9 }
  0x6c   : > { %1073 = shalt.err (!%p1070_p8)
}
  0x6d   : > { %917 = dma.hbm_to_vmem [thread:$0]  (!%p1314_p2), %s317_s0, 16, %s320_s20, %s310_s17  }
  0x6e   : > { %p1491_p6 = scmp.ne.s32.totalorder %s1478_s13, 0 }
  0x6f   : > { %s1373_s29 = sand.u32 (!%p1491_p6), 1, %s1142_s28   ;;  %p1492_p7 = scmp.ne.s32.totalorder (!%p1491_p6), %s1475_s11, 0 }
  0x70   : > { %328 = sbr.rel (%p1491_p6) target bundleno = 904 (0x388), region = 52  ;;  %s828_s10 = sshll.u32 (!%p1491_p6), %s1373_s29, 4 }
  0x71   : > { %s331_s24 = scalar_lea.sflag (!%p1491_p6), [#allocation3], %s1373_s29  ;;  %s334_s26 = scalar_lea.vmem (!%p1491_p6), [#allocation2], %s828_s10 }
  0x75   : > { %1117 = dma.done.wait (%p1492_p7), %s331_s24, 256  }
  0x76   : > { %1119 = vsyncadd (%p1492_p7), %s331_s24, 4294967040  ;;  %s339_s0 = sand.u32 1, %s1227_s9   ;;  %s342_s17 = scalar_lea.vmem [#allocation5], %s1373_s29 }
  0x77   : > { %s340_s13 = scalar_lea.sflag [#allocation6], %s339_s0 }
  0x78   : > { %1121 = dma.done.wait (%p1492_p7), %s340_s13, 16  }
  0x79   : > { %1123 = vsyncadd (%p1492_p7), %s340_s13, 4294967280  ;;  %p1493_p8 = scmp.eq.s32.totalorder %s1227_s9, 0 }
  0x7b   : > { %1125 = dma.done.wait (%p1493_p8), [#allocation6], 512   ;;  %p1494_p2 = pmov %p1493_p8 }
  0x7d   : > { %1127 = vsyncadd (%p1494_p2), [#allocation6], 4294966784  ;;  %p1495_p5 = pmov %p1494_p2 }
  0x7e   : > { %p1496_p12 = pmov %p1494_p2 }
  0x7f   : > { %1129 = dma.done.wait (%p1495_p5), [#allocation9], 512  }
  0x80   : > { %1131 = vsyncadd (%p1496_p12), [#allocation9], 4294966784  ;;  %v388_v0 = vld [vmem:[%s334_s26 + $0x8] sm:$0xff]  ;;  %v832_v1 = vld [vmem:[%s342_s17] ss:$0 sm:$0xff]  ;;  %vm398_vm0 = vcmask 130048   ;;  %v690_v45 = vlaneseq }
  0x81   : > { %v387_v2 = vld [vmem:[%s334_s26] sm:$0xff]  ;;  %v397_v3 = vmul.f32 %v832_v1, %v388_v0  ;;  %vm517_vm1 = vcmask 261120   ;;  %v1158_v23 = vmov 0.0   ;;  %vm1159_vm2 = vmmov 0   ;;  %s831_s25 = sshll.u32 %s1373_s29, 3  ;;  %s842_s4 = sshll.u32 %s1227_s9, 7 }
  0x82   : > { %v396_v4 = vmul.f32 %v832_v1, %v387_v2  ;;  %865 = vmatprep.mubr.msk.f32.mxu0 %vm398_vm0, %v387_v2  ;;  %v428_v7 = vld [vmem:[#allocation7 + $0x18] sm:$0xff]  ;;  %v427_v8 = vld [vmem:[#allocation7 + $0x10] sm:$0xff]  ;;  %v426_v19 = vld [vmem:[#allocation7 + $0x8] sm:$0xff]  ;;  %v691_v46 = vshrl.u32 %v690_v45, 7  ;;  %s386_s6 = scalar_lea.vmem [#allocation10], %s831_s25  ;;  %s707_s24 = scalar_lea.hbm %s1460_s8, %s842_s4 }
  0x83   : > { %v402_v5 = vsel %vm398_vm0, %v397_v3, 0.0  ;;  %868 = vmatprep.subr.mxu1 %v428_v7  ;;  %v833_v9 = vld [vmem:[%s1454_s2] ss:$0 sm:$0xff]  ;;  %v425_v20 = vld [vmem:[#allocation7] sm:$0xff]  ;;  %v614_v25 = vld [vmem:[#allocation8 + $0x10] sm:$0xff]  ;;  %s709_s23 = sshll.u32 %s386_s6, 4  ;;  %s710_s23 = int_to_ptr.vmem [resolvable:$true] %s709_s23 }
  0x84   : > { %403 = vadd.xlane.f32.xlu0 %v402_v5  ;;  %v399_v6 = vsel %vm398_vm0, %v396_v4, 0.0  ;;  %869 = vmatpush3.msra.mxu1 %v428_v7  ;;  %v834_v11 = vld [vmem:[%s1455_s3] ss:$0 sm:$0xff]  ;;  %v613_v26 = vld [vmem:[#allocation8 + $0x8] sm:$0xff]  ;;  %v612_v27 = vld [vmem:[#allocation8] sm:$0xff]  ;;  %v692_v48 = vsub.s32 0, %v691_v46 }
  0x85   : > { %870 = vmatprep.subr.mxu1 %v427_v8  ;;  %v615_v24 = vld [vmem:[#allocation8 + $0x18] sm:$0xff]  ;;  %s696_s26 = scalar_lea.sflag [#allocation4], %s1373_s29  ;;  %s1074_s0 = scalar_lea.vmem %s710_s23, 128 }
  0x86   : > { %871 = vmatpush3.msra.mxu1 %v427_v8  ;;  %v837_v28 = vld [vmem:[%s1457_s5] ss:$0 sm:$0xff]  ;;  %p1075_p0 = scmp.ne.s32.totalorder %s710_s23, %s1074_s0  ;;  %p1497_p10 = scmp.ne.s32.totalorder %s1483_s16, 0 }
  0x87   : > { %872 = vmatprep.subr.mxu1 %v426_v19  ;;  %v616_v47 = vld [vmem:[%s1459_s7] sm:$0x1]  ;;  %s1160_s13 = smov [#allocation10]  }
  0x88   : > { %400 = vadd.xlane.f32.xlu0 %v399_v6  ;;  %873 = vmatpush3.msra.mxu1 %v426_v19  ;;  %p1076_p3 = pnand %p1075_p0, %p1497_p10  ;;  %s1078_s17 = sshll.u32 %s1160_s13, 4  ;;  %s1079_s17 = int_to_ptr.vmem [resolvable:$false] %s1078_s17 }
  0x89   : > { %874 = vmatprep.subr.mxu1 %v425_v20  ;;  %s1080_s9 = scalar_lea.vmem %s1079_s17, 256  ;;  %p1081_p9 = scmp.lt.s32.totalorder %s710_s23, %s1079_s17 }
  0x8a   : > { %875 = vmatpush3.msra.mxu1 %v425_v20  ;;  %p1077_p11 = pneg %p1076_p3  ;;  %p1082_p13 = scmp.lt.s32.totalorder %s1080_s9, %s1074_s0 }
  0x8c   : > { %p1083_p1 = por %p1082_p13, %p1081_p9 }
  0x8e   : > { %p1084_p4 = pnand %p1083_p1, %p1077_p11 }
 0x10d   : > { %v404_v10 = vpop.xlane.xlu0 %403 }
 0x10e   : > { %v414_v12 = vmul.f32 %v833_v9, %v404_v10 }
 0x110   : > { %v422_v13 = vadd.f32 %v834_v11, %v414_v12 }
 0x111   : > { %v401_v14 = vpop.xlane.xlu0 %400 }
 0x112   : > { %v413_v15 = vmul.f32 %v833_v9, %v401_v14  ;;  %v424_v16 = vmax.f32 %v422_v13, 0.0 }
 0x114   : > { %v421_v17 = vadd.f32 %v834_v11, %v413_v15  ;;  %861 = vmatprep.subr.mxu0 %v424_v16 }
 0x115   : > { %862 = vmatpush3.msra.mxu0 %v424_v16 }
 0x116   : > { %v423_v18 = vmax.f32 %v421_v17, 0.0 }
 0x118   : > { %863 = vmatprep.subr.mxu0 %v423_v18 }
 0x119   : > { %864 = vmatpush3.msra.mxu0 %v423_v18 }
 0x11a   : > { %866 = vmatmul.mubr.msk.f32.vlgmr.msra.gmra.mxu0 %vm398_vm0, %v388_v0  ;;  %879 = vmatprep.subr.mxu0 %v1158_v23 }
 0x11b   : > { %880 = vmatpush3.msra.mxu0 %v615_v24  ;;  %887 = vmatprep.mubr.msk.f32.mxu0 %vm1159_vm2, %v1158_v23 }
 0x11c   : > { %881 = vmatprep.subr.mxu0 %v1158_v23 }
 0x11d   : > { %882 = vmatpush3.msra.mxu0 %v614_v25 }
 0x11e   : > { %883 = vmatprep.subr.mxu0 %v1158_v23 }
 0x11f   : > { %884 = vmatpush3.msra.mxu0 %v613_v26 }
 0x120   : > { %885 = vmatprep.subr.mxu0 %v1158_v23 }
 0x121   : > { %886 = vmatpush3.msra.mxu0 %v612_v27 }
 0x1da   : > { %v867_v21 = vpop.f32.mrf.mxu0 }
 0x1dc   : > { %v502_v22 = vpop.f32.mrf.mxu0 }
 0x1dd   : > { %876 = vmatprep.mubr.msk.f32.mxu1 %vm517_vm1, %v502_v22 }
 0x1de   : > { %877 = vmatmul.mubr.msk.f32.vlgmr.msra.gmra.mxu1 %vm517_vm1, %v867_v21 }
 0x29e   : > { %v878_v29 = vpop.f32.mrf.mxu1 }
 0x29f   : > { %v596_v30 = vadd.f32 %v878_v29, %v837_v28 }
 0x2a0   : > { %v590_v31 = vpop.f32.mrf.mxu1 }
 0x2a1   : > { %v600_v32 = vmax.f32 %v596_v30, 0.0  ;;  %v591_v33 = vadd.f32 %v837_v28, %v590_v31 }
 0x2a3   : > { %v599_v34 = vmax.f32 %v591_v33, 0.0  ;;  %v602_v35 = vsel %vm517_vm1, %v600_v32, 0.0 }
 0x2a5   : > { %v601_v36 = vsel %vm517_vm1, %v599_v34, 0.0 }
 0x2a6   : > { %v603_v37 = vadd.f32 %v602_v35, %v601_v36 }
 0x2a8   : > { %v604_v38 = vrot.slane %v603_v37, 4 }
 0x2aa   : > { %v605_v39 = vadd.f32 %v604_v38, %v603_v37 }
 0x2ac   : > { %v606_v40 = vrot.slane %v605_v39, 2 }
 0x2ae   : > { %v607_v41 = vadd.f32 %v606_v40, %v605_v39 }
 0x2b0   : > { %v608_v42 = vrot.slane %v607_v41, 1 }
 0x2b2   : > { %v609_v43 = vadd.f32 %v608_v42, %v607_v41 }
 0x2b4   : > { %v611_v44 = vmul.f32 0.0625, %v609_v43 }
 0x2b6   : > { %888 = vmatmul.mubr.msk.f32.vlgmr.msra.gmra.mxu0 %vm517_vm1, %v611_v44 }
 0x376   : > { %v686_v49 = vpop.f32.mrf.mxu0 }
 0x377   : > { %v687_v50 = vadd.f32 %v686_v49, %v616_v47 }
 0x378   : > { %v889_v51 = vpop.f32.mrf.mxu0 }
 0x379   : > { %v693_v52 = vrot.slane %v687_v50, %v692_v48 }
 0x37b   : > { %694 = vst [vmem:[%s386_s6] sm:$0xff] %v693_v52 }
 0x37c   : > { %1087 = shalt.err (!%p1084_p4)
}
 0x37d   : > { %s1088_s11 = scalar_lea.hbm %s707_s24, 128  ;;  %s1092_s18 = scalar_lea.hbm %s1460_s8, 256 }
 0x37e   : > { %p1089_p6 = scmp.ne.s32.totalorder %s707_s24, %s1088_s11  ;;  %p1093_p2 = scmp.lt.s32.totalorder %s707_s24, %s1460_s8 }
 0x37f   : > { %p1094_p5 = scmp.lt.s32.totalorder %s1092_s18, %s1088_s11 }
 0x380   : > { %p1090_p7 = pnand %p1089_p6, %p1497_p10 }
 0x381   : > { %p1095_p12 = por %p1094_p5, %p1093_p2 }
 0x382   : > { %p1091_p8 = pneg %p1090_p7 }
 0x384   : > { %p1096_p0 = pnand %p1095_p12, %p1091_p8 }
 0x386   : > { %1099 = shalt.err (!%p1096_p0)
}
 0x387   : > { %902 = dma.vmem_to_hbm [thread:$0]  (%p1497_p10), %s710_s23, 128, %s707_s24, %s696_s26  }
 0x388 PF: > { %s1498_s22 = sld [smem:[#allocation17_spill]]  ;;  %s721_s25 = sand.u32 1, %s1138_s27  }
 0x389   : > { %p1500_p11 = scmp.ge.s32.totalorder %s1150_s30, 2  ;;  %s722_s15 = scalar_lea.sflag [#allocation4], %s721_s25 }
 0x38e   : > { %p1499_p3 = scmp.ne.s32.totalorder %s1498_s22, 0 }
 0x390   : > { %p919_p9 = pnand %p1500_p11, %p1499_p3 }
 0x392   : > { %p920_p13 = pneg %p919_p9 }
 0x394   : > { %1133 = dma.done.wait (%p920_p13), %s722_s15, 128  }
 0x395   : > { %1135 = vsyncadd (%p920_p13), %s722_s15, 4294967168  ;;  %s1501_s30 = sld [smem:[#allocation18_spill]]  ;;  %s1504_s27 = smov %s1142_s28 }
 0x396   : > { %s1502_s19 = sld [smem:[#allocation16_spill]] }
 0x397   : > { %s1503_s29 = sld [smem:[#allocation19_spill]] }
 0x39b   : > { %p25_p1 = scmp.ge.s32.totalorder %s1501_s30, 4  }
 0x39c   : > { %s1505_s28 = smov %s1502_s19 }
 0x39d   :  { %27 = sbr.rel (!%p25_p1) target bundleno = 12 (0xc), region = 118 }
 0x3a2   :  { %727 = vsyncpa [#allocation3], 1 }
 0x3a3   :  { %729 = vsyncpa [#allocation3 + $0x1], 1 }
 0x3a4   :  { %730 = vsyncpa [#allocation6], 1 }
 0x3a5   :  { %732 = vsyncpa [#allocation6 + $0x1], 1 }
 0x3a6   :  { %733 = vsyncpa [#allocation9], 1 }
 0x3a7   :  { %734 = vsyncpa [#allocation4], 1 }
 0x3a8   :  { %736 = vsyncpa [#allocation4 + $0x1], 1 }

</bundles_post_ra>
